<compile_context>
chip_gen: v5e
topology: v5e:2x2
jax: 0.10.0
libtpu: 0.0.40
codegen_flags: <defaults>
</compile_context>

<pallas_src>
import functools

import jax
import jax.numpy as jnp
from jax import lax
from jax.experimental import pallas as pl
from jax.experimental.pallas import tpu as pltpu


def _greedy_hash_loss_kernel(desc_ref, crow_ref, ccol_ref, mask_ref, ms_ref, reg_ref,
                             *, scale_p, scale_n, c_p, c_n, inv_alpha, inv_beta,
                             use_shift):
    # (TM, Dp) bf16 sign-codes for this anchor-row block (MXU LHS, exact {-1,0,+1}).
    lhs = crow_ref[...]
    # NN contraction against the resident (Dp, Bc) bf16 codes: B lands on the lane axis,
    # D on the contraction axis -> clean MXU feed, f32 accumulation.
    raw = lax.dot_general(lhs, ccol_ref[...],
                          (((1,), (0,)), ((), ())),
                          preferred_element_type=jnp.float32)        # (TM, Bc)

    # Packed pair mask: bit0 = positive pair, bit1 = negative pair. Stay in int8 (no widen).
    m = mask_ref[...]
    pos_m = (m & jnp.int8(1)) != 0
    neg_m = (m & jnp.int8(2)) != 0

    neg_inf = jnp.float32(-jnp.inf)
    # Folded logits: alpha*(base - raw/D) = c_p - scale_p*raw ; beta*(raw/D - base) = scale_n*raw - c_n
    zp = jnp.where(pos_m, c_p - scale_p * raw, neg_inf)
    zn = jnp.where(neg_m, scale_n * raw - c_n, neg_inf)

    # Lane-axis exp-sums on the (idle) MXU instead of the XLU: sum(e, axis=1) == e @ ones.
    ones_cols = jnp.ones((raw.shape[1], 128), jnp.float32)

    def _row_sum(e):
        s = lax.dot_general(e, ones_cols, (((1,), (0,)), ((), ())),
                            preferred_element_type=jnp.float32)      # (TM, 128)
        return s[:, 0:1]                                             # (TM, 1)

    if use_shift:
        # General path: shifted LSE (needed only when alpha/beta/|base| could overflow f32 exp).
        mp = jnp.maximum(jnp.max(zp, axis=1, keepdims=True), 0.0)
        mn = jnp.maximum(jnp.max(zn, axis=1, keepdims=True), 0.0)
        sp = _row_sum(jnp.exp(zp - mp))                              # exp(-inf)=0 -> masked out
        sn = _row_sum(jnp.exp(zn - mn))
        pos_loss = inv_alpha * (mp + jnp.log(sp + jnp.exp(-mp)))
        neg_loss = inv_beta * (mn + jnp.log(sn + jnp.exp(-mn)))
    else:
        # Statically-safe path (default hyperparameters): no max-shift needed.
        sp = _row_sum(jnp.exp(zp))                                   # exp(-inf)=0 -> masked out
        sn = _row_sum(jnp.exp(zn))
        pos_loss = inv_alpha * jnp.log(1.0 + sp)
        neg_loss = inv_beta * jnp.log(1.0 + sn)

    # Partial MultiSimilarity sum for this anchor-row block; rows with no mined pairs give
    # log(1)=0 and zero-padded rows contribute 0 (MeanReducer divides by B in the wrapper).
    ms_partial = jnp.sum(pos_loss + neg_loss)

    # greedy_hash_reg partial, p=3, f32.  lhs holds exactly sign(x) (bf16 is exact on {-1,0,+1}).
    x = desc_ref[...]
    diff = jnp.abs(x - lhs.astype(jnp.float32))
    reg_partial = jnp.sum(diff * diff * diff)

    # Lane-dense full-tile stores; the wrapper reads element [0, 0] of each tile.
    ms_ref[...] = jnp.full(ms_ref.shape, ms_partial, jnp.float32)
    reg_ref[...] = jnp.full(reg_ref.shape, reg_partial, jnp.float32)


def _round_up(x, m):
    return ((x + m - 1) // m) * m


def _vmem_limit_bytes():
    # Generation-aware VMEM limit: ~75% of physical capacity (v5e/v6e: 96 MiB, v7x: 48 MiB);
    # conservative fallback also fits a v7x TensorCore.
    try:
        info = pltpu.get_tpu_info()
        for name in ("vmem_capacity_bytes", "vmem_bytes"):
            cap = getattr(info, name, None)
            if cap:
                return int(cap) * 3 // 4
    except Exception:
        pass
    return 48 * 1024 * 1024


def _pick_row_tile(batch_rows, b_cols, d_cols, vmem_budget):
    """Largest row tile (multiple of 32) whose live working set fits the VMEM budget."""
    rows32 = max(32, _round_up(batch_rows, 32))
    resident = d_cols * b_cols * 2                              # single-buffered bf16 codes (RHS)
    for tm in (256, 128, 64, 32):
        if tm > rows32:
            continue
        stages = 2 * (tm * d_cols * 4 + tm * d_cols * 2 + tm * b_cols)  # double-buffered inputs
        temps = 24 * tm * b_cols                                # ~live f32 temporaries in the body
        if resident + stages + temps <= (vmem_budget * 3) // 4:
            return tm
    return 32


def _pair_mask_bit(idx_a, idx_b, batch, bit):
    # Scatter-free (B, B) pair mask: one-hot matmul keeps this on the MXU instead of a slow
    # TPU scatter over up to O(B^2) index pairs.
    oh_a = jax.nn.one_hot(idx_a, batch, dtype=jnp.float32)      # (P, B)
    oh_b = jax.nn.one_hot(idx_b, batch, dtype=jnp.float32)      # (P, B)
    cnt = lax.dot_general(oh_a, oh_b, (((0,), (0,)), ((), ())),
                          preferred_element_type=jnp.float32)   # (B, B) pair counts
    # TODO(synk): duplicate (anchor, pair) indices collapse to one mask bit; the torch loss
    # would sum one exp term per occurrence.
    return jnp.where(cnt > 0, jnp.uint8(bit), jnp.uint8(0))


def greedy_hash_loss(descriptors, labels, miner_outputs,
                     alpha=1.0, beta=50.0, base=0.0, reg=1.0):
    """Forward pass of GreedyHashLoss (MultiSimilarity over Hamming-STE + sign regularizer).

    descriptors  : (B, D) float
    labels       : (B,) int  (pairs come from the miner; kept for API parity)
    miner_outputs: (a1, p, a2, n) index arrays (positive / negative pairs)
    """
    del labels
    B, D = descriptors.shape
    a1, p, a2, n = miner_outputs

    desc_f32 = descriptors.astype(jnp.float32)
    codes_f32 = jnp.sign(desc_f32)                       # STE binarization, exactly {-1,0,+1}
    # TODO(synk): TeTRA's HammingDistanceSTE may map sign(0)->+1; jnp.sign(0)=0 matches torch.sign.

    # Packed int8 pair mask (bit0 = pos, bit1 = neg), built scatter-free via one-hot matmuls.
    pair_mask = (_pair_mask_bit(a1, p, B, 1) | _pair_mask_bit(a2, n, B, 2)).astype(jnp.int8)

    # Padding (all exact): feature / pair-column axes to multiples of 128 (sign(0)=0 and padded
    # mask=0 contribute nothing), anchor rows to a multiple of the row tile (zero rows give 0).
    D_pad = _round_up(D, 128)
    Bc_pad = _round_up(B, 128)
    vmem_limit = _vmem_limit_bytes()
    TM = _pick_row_tile(B, Bc_pad, D_pad, vmem_limit)
    Br_pad = _round_up(B, TM)
    num_blocks = Br_pad // TM

    desc_p = jnp.pad(desc_f32, ((0, Br_pad - B), (0, D_pad - D)))
    crow_p = jnp.pad(codes_f32, ((0, Br_pad - B), (0, D_pad - D))).astype(jnp.bfloat16)
    ccol_p = jnp.pad(codes_f32.T, ((0, D_pad - D), (0, Bc_pad - B))).astype(jnp.bfloat16)
    mask_p = jnp.pad(pair_mask, ((0, Br_pad - B), (0, Bc_pad - B)))

    # Drop the LSE max-shift only when it is statically safe for f32 exp (|S_ij| <= 1).
    max_logit = max(abs(float(alpha)), abs(float(beta))) * (abs(float(base)) + 1.0)
    use_shift = max_logit >= 80.0

    kernel = functools.partial(
        _greedy_hash_loss_kernel,
        scale_p=float(alpha) / float(D),
        scale_n=float(beta) / float(D),
        c_p=float(alpha) * float(base),
        c_n=float(beta) * float(base),
        inv_alpha=1.0 / float(alpha),
        inv_beta=1.0 / float(beta),
        use_shift=use_shift,
    )

    ms_part, reg_part = pl.pallas_call(
        kernel,
        out_shape=(jax.ShapeDtypeStruct((num_blocks, 8, 128), jnp.float32),
                   jax.ShapeDtypeStruct((num_blocks, 8, 128), jnp.float32)),
        grid_spec=pltpu.PrefetchScalarGridSpec(
            num_scalar_prefetch=0,
            grid=(num_blocks,),
            in_specs=[
                pl.BlockSpec((TM, D_pad), lambda i: (i, 0)),           # f32 descriptor rows
                pl.BlockSpec((TM, D_pad), lambda i: (i, 0)),           # bf16 sign-code rows (MXU LHS)
                pl.BlockSpec((D_pad, Bc_pad), lambda i: (0, 0),
                             pipeline_mode=pl.Buffered(1)),            # resident codes (NN RHS), single-buffered
                pl.BlockSpec((TM, Bc_pad), lambda i: (i, 0)),          # packed int8 pair mask
            ],
            out_specs=[
                pl.BlockSpec((1, 8, 128), lambda i: (i, 0, 0)),
                pl.BlockSpec((1, 8, 128), lambda i: (i, 0, 0)),
            ],
        ),
        compiler_params=pltpu.CompilerParams(
            dimension_semantics=("parallel",),            # row blocks independent -> 2 TCs on v7x
            vmem_limit_bytes=vmem_limit,
        ),
    )(desc_p, crow_p, ccol_p, mask_p)

    # Tiny final reductions in the wrapper (keeps the grid axis truly parallel).
    l1 = jnp.sum(ms_part[:, 0, 0]) / jnp.float32(B)       # MeanReducer over all B anchors
    # TODO(synk): assumes pytorch-metric-learning's MeanReducer averages over all B anchors
    # (empty rows included) for this configuration.
    reg_loss = jnp.float32(reg) * jnp.sum(reg_part[:, 0, 0]) / jnp.float32(B * D)
    return l1 + reg_loss


def _reference_loss(descriptors, miner_outputs, alpha=1.0, beta=50.0, base=0.0, reg=1.0):
    # Pure-JAX reference of the same forward semantics (smoke-test only).
    B, D = descriptors.shape
    a1, p, a2, n = miner_outputs
    x = descriptors.astype(jnp.float32)
    b = jnp.sign(x)
    sim = (b @ b.T) / D
    pos_m = jnp.zeros((B, B), bool).at[a1, p].set(True)
    neg_m = jnp.zeros((B, B), bool).at[a2, n].set(True)
    ep = jnp.where(pos_m, jnp.exp(alpha * (base - sim)), 0.0)
    en = jnp.where(neg_m, jnp.exp(beta * (sim - base)), 0.0)
    pos_loss = (1.0 / alpha) * jnp.log1p(jnp.sum(ep, axis=1))
    neg_loss = (1.0 / beta) * jnp.log1p(jnp.sum(en, axis=1))
    l1 = jnp.mean(pos_loss + neg_loss)
    diff = jnp.abs(x - b)
    return l1 + reg * jnp.sum(diff ** 3) / (B * D)


if __name__ == "__main__":
    key = jax.random.PRNGKey(0)
    B, D = 8, 128
    descriptors = jax.random.normal(key, (B, D), dtype=jnp.float32)
    labels = jnp.array([0, 0, 1, 1, 2, 2, 3, 3], dtype=jnp.int32)

    # Synthetic "miner_outputs": all positive pairs (same label, i != j) and all negative
    # pairs (different label), as index tuples (a1, p, a2, n).
    same = labels[:, None] == labels[None, :]
    eye = jnp.eye(B, dtype=bool)
    pos_i, pos_j = jnp.nonzero(same & ~eye)
    neg_i, neg_j = jnp.nonzero(~same)
    miner_outputs = (pos_i, pos_j, neg_i, neg_j)

    loss = greedy_hash_loss(descriptors, labels, miner_outputs,
                            alpha=1.0, beta=50.0, base=0.0, reg=1.0)
    loss = jax.block_until_ready(loss)
    ref = jax.block_until_ready(_reference_loss(descriptors, miner_outputs,
                                                alpha=1.0, beta=50.0, base=0.0, reg=1.0))
    assert loss.shape == () and bool(jnp.isfinite(loss))
    assert bool(jnp.allclose(loss, ref, rtol=2e-3, atol=2e-3)), (loss, ref)
    print("KERNEL_OK")
</pallas_src>

<mosaic_0001>
module attributes {stable_mosaic.version = 11 : i64} {
  func.func @_greedy_hash_loss_kernel(%arg0: i32, %arg1: memref<32x128xf32, #tpu.memory_space<vmem>>, %arg2: memref<32x128xbf16, #tpu.memory_space<vmem>>, %arg3: memref<128x128xbf16, #tpu.memory_space<vmem>>, %arg4: memref<32x128xi8, #tpu.memory_space<vmem>>, %arg5: memref<1x8x128xf32, #tpu.memory_space<vmem>>, %arg6: memref<1x8x128xf32, #tpu.memory_space<vmem>>) attributes {dimension_semantics = [#tpu.dimension_semantics<parallel>], iteration_bounds = array<i64: 1>, scalar_prefetch = 0 : i64, scratch_operands = 0 : i64, tpu.core_type = #tpu.core_type<tc>, window_params = [{transform_indices = @transform_0, window_bounds = array<i64: 32, 128>}, {transform_indices = @transform_1, window_bounds = array<i64: 32, 128>}, {pipeline_mode = #tpu.pipeline_mode<synchronous>, transform_indices = @transform_2, window_bounds = array<i64: 128, 128>}, {transform_indices = @transform_3, window_bounds = array<i64: 32, 128>}, {transform_indices = @transform_4, window_bounds = array<i64: 1, 8, 128>}, {transform_indices = @transform_5, window_bounds = array<i64: 1, 8, 128>}]} {
    %c0 = arith.constant 0 : index
    %c0_0 = arith.constant 0 : index
    %0 = vector.load %arg2[%c0, %c0_0] : memref<32x128xbf16, #tpu.memory_space<vmem>>, vector<32x128xbf16>
    %c0_1 = arith.constant 0 : index
    %c0_2 = arith.constant 0 : index
    %1 = vector.load %arg3[%c0_1, %c0_2] : memref<128x128xbf16, #tpu.memory_space<vmem>>, vector<128x128xbf16>
    %cst = arith.constant dense<0.000000e+00> : vector<32x128xf32>
    %2 = tpu.matmul %0, %1, %cst {dimension_numbers = #tpu.dot_dimension_numbers<[1], [0], [0], [1], [0, 0, 1, 1], [], []>} : vector<32x128xbf16>, vector<128x128xbf16>, vector<32x128xf32> -> vector<32x128xf32>
    %c0_3 = arith.constant 0 : index
    %c0_4 = arith.constant 0 : index
    %3 = vector.load %arg4[%c0_3, %c0_4] : memref<32x128xi8, #tpu.memory_space<vmem>>, vector<32x128xi8>
    %c1_i8 = arith.constant 1 : i8
    %4 = vector.broadcast %c1_i8 : i8 to vector<32x128xi8>
    %5 = arith.andi %3, %4 : vector<32x128xi8>
    %c0_i8 = arith.constant 0 : i8
    %6 = vector.broadcast %c0_i8 : i8 to vector<32x128xi8>
    %7 = arith.cmpi ne, %5, %6 : vector<32x128xi8>
    %c2_i8 = arith.constant 2 : i8
    %8 = vector.broadcast %c2_i8 : i8 to vector<32x128xi8>
    %9 = arith.andi %3, %8 : vector<32x128xi8>
    %c0_i8_5 = arith.constant 0 : i8
    %10 = vector.broadcast %c0_i8_5 : i8 to vector<32x128xi8>
    %11 = arith.cmpi ne, %9, %10 : vector<32x128xi8>
    %cst_6 = arith.constant 7.812500e-03 : f32
    %12 = vector.broadcast %cst_6 : f32 to vector<32x128xf32>
    %13 = arith.mulf %12, %2 : vector<32x128xf32>
    %cst_7 = arith.constant 0.000000e+00 : f32
    %14 = vector.broadcast %cst_7 : f32 to vector<32x128xf32>
    %15 = arith.subf %14, %13 : vector<32x128xf32>
    %cst_8 = arith.constant 0xFF800000 : f32
    %16 = vector.broadcast %cst_8 : f32 to vector<32x128xf32>
    %17 = arith.select %7, %15, %16 : vector<32x128xi1>, vector<32x128xf32>
    %cst_9 = arith.constant 3.906250e-01 : f32
    %18 = vector.broadcast %cst_9 : f32 to vector<32x128xf32>
    %19 = arith.mulf %18, %2 : vector<32x128xf32>
    %cst_10 = arith.constant 0.000000e+00 : f32
    %20 = vector.broadcast %cst_10 : f32 to vector<32x128xf32>
    %21 = arith.subf %19, %20 : vector<32x128xf32>
    %cst_11 = arith.constant 0xFF800000 : f32
    %22 = vector.broadcast %cst_11 : f32 to vector<32x128xf32>
    %23 = arith.select %11, %21, %22 : vector<32x128xi1>, vector<32x128xf32>
    %cst_12 = arith.constant 1.000000e+00 : f32
    %24 = vector.broadcast %cst_12 : f32 to vector<128x128xf32>
    %25 = math.exp %17 : vector<32x128xf32>
    %cst_13 = arith.constant dense<0.000000e+00> : vector<32x128xf32>
    %26 = tpu.matmul %25, %24, %cst_13 {dimension_numbers = #tpu.dot_dimension_numbers<[1], [0], [0], [1], [0, 0, 1, 1], [], []>} : vector<32x128xf32>, vector<128x128xf32>, vector<32x128xf32> -> vector<32x128xf32>
    %27 = vector.extract_strided_slice %26 {offsets = [0, 0], sizes = [32, 1], strides = [1, 1]} : vector<32x128xf32> to vector<32x1xf32>
    %28 = math.exp %23 : vector<32x128xf32>
    %cst_14 = arith.constant dense<0.000000e+00> : vector<32x128xf32>
    %29 = tpu.matmul %28, %24, %cst_14 {dimension_numbers = #tpu.dot_dimension_numbers<[1], [0], [0], [1], [0, 0, 1, 1], [], []>} : vector<32x128xf32>, vector<128x128xf32>, vector<32x128xf32> -> vector<32x128xf32>
    %30 = vector.extract_strided_slice %29 {offsets = [0, 0], sizes = [32, 1], strides = [1, 1]} : vector<32x128xf32> to vector<32x1xf32>
    %cst_15 = arith.constant 1.000000e+00 : f32
    %31 = vector.broadcast %cst_15 : f32 to vector<32x1xf32>
    %32 = arith.addf %31, %27 : vector<32x1xf32>
    %33 = math.log %32 : vector<32x1xf32>
    %cst_16 = arith.constant 1.000000e+00 : f32
    %34 = vector.broadcast %cst_16 : f32 to vector<32x1xf32>
    %35 = arith.mulf %34, %33 : vector<32x1xf32>
    %cst_17 = arith.constant 1.000000e+00 : f32
    %36 = vector.broadcast %cst_17 : f32 to vector<32x1xf32>
    %37 = arith.addf %36, %30 : vector<32x1xf32>
    %38 = math.log %37 : vector<32x1xf32>
    %cst_18 = arith.constant 2.000000e-02 : f32
    %39 = vector.broadcast %cst_18 : f32 to vector<32x1xf32>
    %40 = arith.mulf %39, %38 : vector<32x1xf32>
    %41 = arith.addf %35, %40 : vector<32x1xf32>
    %42 = vector.shape_cast %41 : vector<32x1xf32> to vector<1x32x1xf32>
    %cst_19 = arith.constant dense<0.000000e+00> : vector<1xf32>
    %43 = vector.multi_reduction <add>, %42, %cst_19 [1, 2] : vector<1x32x1xf32> to vector<1xf32>
    %44 = vector.shape_cast %43 : vector<1xf32> to vector<1x1x1xf32>
    %45 = vector.extract %44[0, 0, 0] : f32 from vector<1x1x1xf32>
    %c0_20 = arith.constant 0 : index
    %c0_21 = arith.constant 0 : index
    %46 = vector.load %arg1[%c0_20, %c0_21] : memref<32x128xf32, #tpu.memory_space<vmem>>, vector<32x128xf32>
    %47 = arith.extf %0 : vector<32x128xbf16> to vector<32x128xf32>
    %48 = arith.subf %46, %47 : vector<32x128xf32>
    %49 = math.absf %48 : vector<32x128xf32>
    %50 = arith.mulf %49, %49 : vector<32x128xf32>
    %51 = arith.mulf %50, %49 : vector<32x128xf32>
    %52 = vector.shape_cast %51 : vector<32x128xf32> to vector<1x32x128xf32>
    %cst_22 = arith.constant dense<0.000000e+00> : vector<1xf32>
    %53 = vector.multi_reduction <add>, %52, %cst_22 [1, 2] : vector<1x32x128xf32> to vector<1xf32>
    %54 = vector.shape_cast %53 : vector<1xf32> to vector<1x1x1xf32>
    %55 = vector.extract %54[0, 0, 0] : f32 from vector<1x1x1xf32>
    %56 = vector.broadcast %45 : f32 to vector<1x8x128xf32>
    %c0_23 = arith.constant 0 : index
    %c0_24 = arith.constant 0 : index
    %c0_25 = arith.constant 0 : index
    %57 = vector.load %arg5[%c0_23, %c0_24, %c0_25] : memref<1x8x128xf32, #tpu.memory_space<vmem>>, vector<1x8x128xf32>
    tpu.vector_store %arg5[%c0_23, %c0_24, %c0_25], %56 {strides = array<i32>} : memref<1x8x128xf32, #tpu.memory_space<vmem>>, vector<1x8x128xf32>,
    %58 = vector.broadcast %55 : f32 to vector<1x8x128xf32>
    %c0_26 = arith.constant 0 : index
    %c0_27 = arith.constant 0 : index
    %c0_28 = arith.constant 0 : index
    %59 = vector.load %arg6[%c0_26, %c0_27, %c0_28] : memref<1x8x128xf32, #tpu.memory_space<vmem>>, vector<1x8x128xf32>
    tpu.vector_store %arg6[%c0_26, %c0_27, %c0_28], %58 {strides = array<i32>} : memref<1x8x128xf32, #tpu.memory_space<vmem>>, vector<1x8x128xf32>,
    return
  }
  func.func @transform_0(%arg0: i32) -> (i32, i32) {
    %c0_i32 = arith.constant 0 : i32
    %c0_i32_0 = arith.constant 0 : i32
    return %arg0, %c0_i32 : i32, i32
  }
  func.func @transform_1(%arg0: i32) -> (i32, i32) {
    %c0_i32 = arith.constant 0 : i32
    %c0_i32_0 = arith.constant 0 : i32
    return %arg0, %c0_i32 : i32, i32
  }
  func.func @transform_2(%arg0: i32) -> (i32, i32) {
    %c0_i32 = arith.constant 0 : i32
    %c0_i32_0 = arith.constant 0 : i32
    %c0_i32_1 = arith.constant 0 : i32
    return %c0_i32, %c0_i32_0 : i32, i32
  }
  func.func @transform_3(%arg0: i32) -> (i32, i32) {
    %c0_i32 = arith.constant 0 : i32
    %c0_i32_0 = arith.constant 0 : i32
    return %arg0, %c0_i32 : i32, i32
  }
  func.func @transform_4(%arg0: i32) -> (i32, i32, i32) {
    %c0_i32 = arith.constant 0 : i32
    %c0_i32_0 = arith.constant 0 : i32
    %c0_i32_1 = arith.constant 0 : i32
    return %arg0, %c0_i32, %c0_i32_0 : i32, i32, i32
  }
  func.func @transform_5(%arg0: i32) -> (i32, i32, i32) {
    %c0_i32 = arith.constant 0 : i32
    %c0_i32_0 = arith.constant 0 : i32
    %c0_i32_1 = arith.constant 0 : i32
    return %arg0, %c0_i32, %c0_i32_0 : i32, i32, i32
  }
}

</mosaic_0001>

<bundles_post_ra>
// kernel: tpu_custom_call.1
= control target key start
LH: loop header
LB: loop body
LE: loop exit
PB: predicated region body
PF: predicated region fallthrough
CT: control target
= control target key end

     0   :  { %11 = vsyncpa [#allocation3], 0  ;;  %s805_s0 = inlined_call_operand.hbm [shape: f32[32,128], index: 0, kind: input, shape index: {}]   ;;  %s806_s1 = inlined_call_operand.hbm [shape: bf16[32,128], index: 1, kind: input, shape index: {}]   ;;  %s807_s2 = inlined_call_operand.hbm [shape: bf16[128,128], index: 2, kind: input, shape index: {}]   ;;  %s808_s3 = inlined_call_operand.hbm [shape: s8[32,128], index: 3, kind: input, shape index: {}]   ;;  %s809_s4 = inlined_call_operand.hbm [shape: f32[1,8,128], index: 4, kind: output, shape index: {0}]   ;;  %s810_s5 = inlined_call_operand.hbm [shape: f32[1,8,128], index: 5, kind: output, shape index: {1}]  }
   0x1   :  { %12 = vsyncpa [#allocation6], 0 }
   0x2   :  { %13 = vsyncpa [#allocation9], 0 }
   0x3   :  { %14 = vsyncpa [#allocation4], 0  ;;  %s33_s20 = sshll.u32 %s806_s1, 4  ;;  %s34_s20 = int_to_ptr.hbm [resolvable:$true] %s33_s20 }
   0x4   :  { %15 = vsyncpa [#allocation12], 0  ;;  %s725_s21 = smov [#allocation5]   ;;  %s20_s25 = sshll.u32 %s805_s0, 4  ;;  %s21_s25 = int_to_ptr.hbm [resolvable:$true] %s20_s25 }
   0x5   :  { %s35_s22 = sshll.u32 %s725_s21, 4  ;;  %s726_s26 = smov 64   ;;  %s36_s22 = int_to_ptr.vmem [resolvable:$true] %s35_s22 }
   0x6   :  { %s727_s27 = smov 4   ;;  %s728_s28 = smov [#allocation2]  }
   0x7   :  { %41 = dma.hbm_to_vmem [thread:$0]  %s34_s20, 256, %s36_s22, [#allocation6], %s726_s26, %s726_s26, %s727_s27  }
   0x8   :  { %s22_s29 = sshll.u32 %s728_s28, 4  ;;  %s729_s30 = smov 128   ;;  %s23_s29 = int_to_ptr.vmem [resolvable:$true] %s22_s29 }
   0x9   :  { %s730_s6 = smov 8   ;;  %s46_s8 = sshll.u32 %s807_s2, 4  ;;  %s47_s8 = int_to_ptr.hbm [resolvable:$true] %s46_s8 }
   0xa   :  { %28 = dma.hbm_to_vmem [thread:$0]  %s21_s25, 512, %s23_s29, [#allocation3], %s729_s30, %s729_s30, %s730_s6  }
   0xb   :  { %s731_s9 = smov [#allocation7]   ;;  %s60_s12 = sshll.u32 %s808_s3, 4  ;;  %s61_s12 = int_to_ptr.hbm [resolvable:$true] %s60_s12 }
   0xc   :  { %s48_s10 = sshll.u32 %s731_s9, 4  ;;  %s732_s13 = smov [#allocation8]   ;;  %s49_s10 = int_to_ptr.vmem [resolvable:$true] %s48_s10 }
   0xd   :  { %54 = dma.hbm_to_vmem [thread:$0]  %s47_s8, 1024, %s49_s10, [#allocation6], %s726_s26, %s726_s26, %s727_s27  }
   0xe   :  { %s62_s14 = sshll.u32 %s732_s13, 4  ;;  %s63_s14 = int_to_ptr.vmem [resolvable:$true] %s62_s14 }
   0xf   :  { %65 = dma.hbm_to_vmem [thread:$0]  %s61_s12, 128, %s63_s14, [#allocation9]  }
  0x10   :  { %715 = dma.done.wait [#allocation3], 512  }
  0x11   :  { %716 = vsyncadd [#allocation3], 4294966784 }
  0x12   :  { %717 = dma.done.wait [#allocation6], 1280  }
  0x13   :  { %718 = vsyncadd [#allocation6], 4294966016 }
  0x14   :  { %719 = dma.done.wait [#allocation9], 128  }
  0x15   :  { %720 = vsyncadd [#allocation9], 4294967168  ;;  %v514_v0 = vld [vmem:[#allocation7 + $0x38] sm:$0xff]  ;;  %v513_v1 = vld [vmem:[#allocation7 + $0x30] sm:$0xff]  ;;  %v733_v2 = vmov 1.0   ;;  %v734_v14 = vmov 0  }
  0x16   :  { %165 = vmatpush.bf16.msra.mxu0 %v514_v0  ;;  %515 = vmatpush.bf16.msra.mxu3 %v514_v0  ;;  %v512_v3 = vld [vmem:[#allocation7 + $0x28] sm:$0xff]  ;;  %v511_v4 = vld [vmem:[#allocation7 + $0x20] sm:$0xff]  ;;  %v510_v5 = vld [vmem:[#allocation7 + $0x18] sm:$0xff]  ;;  %s735_s2 = smov [#allocation10]   ;;  %s437_s17 = sshll.u32 %s809_s4, 4  ;;  %s438_s17 = int_to_ptr.hbm [resolvable:$true] %s437_s17 }
  0x17   :  { %312 = vmatpush.msra.mxu2 %v733_v2  ;;  %275 = vmatpush.msra.mxu1 %v733_v2  ;;  %v509_v6 = vld [vmem:[#allocation7 + $0x10] sm:$0xff]  ;;  %v508_v7 = vld [vmem:[#allocation7 + $0x8] sm:$0xff]  ;;  %v507_v8 = vld [vmem:[#allocation7] sm:$0xff]  ;;  %s435_s3 = sshll.u32 %s735_s2, 4  ;;  %s736_s19 = smov [#allocation11]   ;;  %s436_s3 = int_to_ptr.vmem [resolvable:$true] %s435_s3 }
  0x18   :  { %v505_v9 = vld [vmem:[#allocation5] sm:$0xff]  ;;  %v506_v10 = vld [vmem:[#allocation5 + $0x8] sm:$0xff]  ;;  %v184_v11 = vld [vmem:[#allocation8] sm:$0xff]  ;;  %s446_s20 = sshll.u32 %s736_s19, 4  ;;  %s448_s23 = sshll.u32 %s810_s5, 4  ;;  %s447_s20 = int_to_ptr.vmem [resolvable:$true] %s446_s20  ;;  %s449_s23 = int_to_ptr.hbm [resolvable:$true] %s448_s23 }
  0x19   :  { %313 = vmatpush.msra.mxu2 %v733_v2  ;;  %276 = vmatpush.msra.mxu1 %v733_v2  ;;  %v187_v12 = vand.u32 33686018, %v184_v11  ;;  %v185_v13 = vand.u32 16843009, %v184_v11 }
  0x1a   :  { %166 = vmatpush.bf16.msra.mxu0 %v513_v1  ;;  %516 = vmatpush.bf16.msra.mxu3 %v513_v1 }
  0x1b   :  { %314 = vmatpush.msra.mxu2 %v733_v2  ;;  %277 = vmatpush.msra.mxu1 %v733_v2  ;;  %vm188_vm0 = vnez %v187_v12  ;;  %vm186_vm1 = vnez %v185_v13 }
  0x1c   :  { %v234_v15 = vsel %vm188_vm0, 16843009, %v734_v14  ;;  %v197_v16 = vsel %vm186_vm1, 16843009, %v734_v14 }
  0x1d   :  { %315 = vmatpush.msra.mxu2 %v733_v2  ;;  %278 = vmatpush.msra.mxu1 %v733_v2  ;;  %v235_v17 = vunpack.c.0.s8 %v234_v15  ;;  %v198_v18 = vunpack.c.0.s8 %v197_v16  ;;  %v236_v22 = vunpack.c.1.s8 %v234_v15  ;;  %v199_v23 = vunpack.c.1.s8 %v197_v16 }
  0x1e   :  { %167 = vmatpush.bf16.msra.mxu0 %v512_v3  ;;  %517 = vmatpush.bf16.msra.mxu3 %v512_v3  ;;  %v237_v25 = vunpack.c.2.s8 %v234_v15  ;;  %v200_v27 = vunpack.c.2.s8 %v197_v16  ;;  %v238_v39 = vunpack.c.3.s8 %v234_v15  ;;  %v201_v41 = vunpack.c.3.s8 %v197_v16 }
  0x1f   :  { %316 = vmatpush.msra.mxu2 %v733_v2  ;;  %279 = vmatpush.msra.mxu1 %v733_v2  ;;  %v239_v19 = vpack.c.b16 %v235_v17, %v235_v17  ;;  %v202_v20 = vpack.c.b16 %v198_v18, %v198_v18  ;;  %v241_v26 = vpack.c.b16 %v236_v22, %v236_v22 }
  0x20   :  { %v204_v28 = vpack.c.b16 %v199_v23, %v199_v23  ;;  %v243_v29 = vpack.c.b16 %v237_v25, %v237_v25  ;;  %v206_v32 = vpack.c.b16 %v200_v27, %v200_v27  ;;  %v245_v46 = vpack.c.b16 %v238_v39, %v238_v39 }
  0x21   :  { %317 = vmatpush.msra.mxu2 %v733_v2  ;;  %280 = vmatpush.msra.mxu1 %v733_v2  ;;  %v240_v21 = vpack.c.b8 %v239_v19, %v239_v19  ;;  %v203_v24 = vpack.c.b8 %v202_v20, %v202_v20  ;;  %v242_v31 = vpack.c.b8 %v241_v26, %v241_v26 }
  0x22   :  { %168 = vmatpush.bf16.msra.mxu0 %v511_v4  ;;  %518 = vmatpush.bf16.msra.mxu3 %v511_v4  ;;  %v205_v34 = vpack.c.b8 %v204_v28, %v204_v28  ;;  %v244_v36 = vpack.c.b8 %v243_v29, %v243_v29  ;;  %v207_v38 = vpack.c.b8 %v206_v32, %v206_v32 }
  0x23   :  { %318 = vmatpush.msra.mxu2 %v733_v2  ;;  %281 = vmatpush.msra.mxu1 %v733_v2  ;;  %vm247_vm2 = vnez %v240_v21  ;;  %vm210_vm3 = vnez %v203_v24  ;;  %vm248_vm4 = vnez %v242_v31  ;;  %v208_v52 = vpack.c.b16 %v201_v41, %v201_v41 }
  0x24   :  { %v251_v30 = vsel %vm247_vm2, 16843009, %v734_v14  ;;  %v214_v33 = vsel %vm210_vm3, 16843009, %v734_v14  ;;  %vm211_vm5 = vnez %v205_v34  ;;  %vm249_vm7 = vnez %v244_v36 }
  0x25   :  { %319 = vmatpush.msra.mxu2 %v733_v2  ;;  %282 = vmatpush.msra.mxu1 %v733_v2  ;;  %v255_v35 = vunpack.c.0.s8 %v251_v30  ;;  %v218_v37 = vunpack.c.0.s8 %v214_v33  ;;  %v252_v44 = vsel %vm248_vm4, 16843009, %v734_v14  ;;  %v215_v45 = vsel %vm211_vm5, 16843009, %v734_v14 }
  0x26   :  { %169 = vmatpush.bf16.msra.mxu0 %v510_v5  ;;  %519 = vmatpush.bf16.msra.mxu3 %v510_v5  ;;  %vm212_vm9 = vnez %v207_v38  ;;  %v253_v49 = vsel %vm249_vm7, 16843009, %v734_v14  ;;  %v256_v51 = vunpack.c.0.s8 %v252_v44  ;;  %v219_v54 = vunpack.c.0.s8 %v215_v45  ;;  %v85_v44 = vld [vmem:[#allocation5] sm:$0xff]  }
  0x27   :  { %320 = vmatpush.msra.mxu2 %v733_v2  ;;  %283 = vmatpush.msra.mxu1 %v733_v2  ;;  %vm259_vm6 = vcmp.ne.s32.totalorder %v255_v35, 0  ;;  %vm222_vm8 = vcmp.ne.s32.totalorder %v218_v37, 0  ;;  %v216_v55 = vsel %vm212_vm9, 16843009, %v734_v14  ;;  %v257_v58 = vunpack.c.0.s8 %v253_v49 }
  0x28   :  { %v246_v59 = vpack.c.b8 %v245_v46, %v245_v46  ;;  %vm260_vm10 = vcmp.ne.s32.totalorder %v256_v51, 0  ;;  %v220_v62 = vunpack.c.0.s8 %v216_v55  ;;  %v209_v63 = vpack.c.b8 %v208_v52, %v208_v52  ;;  %v87_v51 = vld [vmem:[#allocation5 + $0x8] sm:$0xff]   ;;  %v390_v52 = vld [vmem:[#allocation2] sm:$0xff] }
  0x29   :  { %321 = vmatpush.msra.mxu2 %v733_v2  ;;  %284 = vmatpush.msra.mxu1 %v733_v2  ;;  %vm223_vm11 = vcmp.ne.s32.totalorder %v219_v54, 0  ;;  %vm787_vm12 = vcmp.ne.s32.totalorder %v257_v58, 0  ;;  %v395_v49 = vunpack.c.h.bf16 %v85_v44  ;;  %vm373_vm2 = vcmask 7168  }
  0x2a   :  { %170 = vmatpush.bf16.msra.mxu0 %v509_v6  ;;  %520 = vmatpush.bf16.msra.mxu3 %v509_v6  ;;  %vm250_vm13 = vnez %v246_v59  ;;  %vm224_vm14 = vcmp.ne.s32.totalorder %v220_v62, 0  ;;  %vm213_vm15 = vnez %v209_v63  ;;  %v392_v63 = vld [vmem:[#allocation2 + $0x10] sm:$0xff] }
  0x2b   :  { %322 = vmatpush.msra.mxu2 %v733_v2  ;;  %285 = vmatpush.msra.mxu1 %v733_v2  ;;  %v254_v11 = vsel %vm250_vm13, 16843009, %v734_v14  ;;  %v217_v17 = vsel %vm213_vm15, 16843009, %v734_v14 }
  0x2c   :  { %v258_v19 = vunpack.c.0.s8 %v254_v11  ;;  %v221_v22 = vunpack.c.0.s8 %v217_v17 }
  0x2d   :  { %323 = vmatpush.msra.mxu2 %v733_v2  ;;  %286 = vmatpush.msra.mxu1 %v733_v2 }
  0x2e   :  { %171 = vmatpush.bf16.msra.mxu0 %v508_v7  ;;  %521 = vmatpush.bf16.msra.mxu3 %v508_v7  ;;  %vm262_vm0 = vcmp.ne.s32.totalorder %v258_v19, 0  ;;  %vm225_vm1 = vcmp.ne.s32.totalorder %v221_v22, 0 }
  0x2f   :  { %324 = vmatpush.msra.mxu2 %v733_v2  ;;  %287 = vmatpush.msra.mxu1 %v733_v2 }
  0x31   :  { %325 = vmatpush.msra.mxu2 %v733_v2  ;;  %288 = vmatpush.msra.mxu1 %v733_v2 }
  0x32   :  { %172 = vmatpush.bf16.msra.mxu0 %v507_v8  ;;  %522 = vmatpush.bf16.msra.mxu3 %v507_v8 }
  0x33   :  { %326 = vmatpush.msra.mxu2 %v733_v2  ;;  %289 = vmatpush.msra.mxu1 %v733_v2 }
  0x35   :  { %173 = vmatmul.bf16.vlgmr.msra.gmra.mxu0 %v505_v9  ;;  %178 = vmatmul.bf16.vlgmr.msra.gmra.mxu3 %v506_v10 }
  0x36   :  { %327 = vmatpush.msra.mxu2 %v733_v2  ;;  %290 = vmatpush.msra.mxu1 %v733_v2 }
  0xb2   :  { %v174_v40 = vpop.f32.mrf.mxu0 }
  0xb3   :  { %v189_v42 = vmul.f32 0.0078125, %v174_v40  ;;  %v230_v43 = vmul.f32 0.390625, %v174_v40 }
  0xb5   :  { %v193_v47 = vsub.f32 0.0, %v189_v42  ;;  %v263_v48 = vsel %vm259_vm6, %v230_v43, -inf }
  0xb6   :  { %v304_v50 = vmul.f32 1.442695, %v263_v48  ;;  %v394_v48 = vunpack.c.l.bf16 %v85_v44 }
  0xb7   :  { %v226_v53 = vsel %vm222_vm8, %v193_v47, -inf }
  0xb8   :  { %v267_v56 = vmul.f32 1.442695, %v226_v53  ;;  %539 = vpow2.f32 %v304_v50  ;;  %v179_v57 = vpop.f32.mrf.mxu3  ;;  %v391_v53 = vld [vmem:[#allocation2 + $0x8] sm:$0xff]  ;;  %v398_v58 = vsub.f32 %v390_v52, %v394_v48 }
  0xb9   :  { %v191_v60 = vmul.f32 0.0078125, %v179_v57  ;;  %v232_v2 = vmul.f32 0.390625, %v179_v57  ;;  %v396_v57 = vunpack.c.l.bf16 %v87_v51  ;;  %v399_v59 = vsub.f32 %v391_v53, %v395_v49 }
  0xba   :  { %541 = vpow2.f32 %v267_v56  ;;  %v176_v61 = vpop.f32.mrf.mxu0 }
  0xbb   :  { %v190_v0 = vmul.f32 0.0078125, %v176_v61  ;;  %v231_v1 = vmul.f32 0.390625, %v176_v61  ;;  %v195_v6 = vsub.f32 0.0, %v191_v60  ;;  %v265_v10 = vsel %vm787_vm12, %v232_v2, -inf }
  0xbc   :  { %v308_v18 = vmul.f32 1.442695, %v265_v10  ;;  %v403_v10 = vand.u32 2147483647, %v399_v59 }
  0xbd   :  { %v194_v4 = vsub.f32 0.0, %v190_v0  ;;  %v264_v5 = vsel %vm260_vm10, %v231_v1, -inf  ;;  %v228_v16 = vsel %vm224_vm14, %v195_v6, -inf }
  0xbe   :  { %v540_v7 = vpop.eup %539  ;;  %v306_v8 = vmul.f32 1.442695, %v264_v5  ;;  %v271_v21 = vmul.f32 1.442695, %v228_v16  ;;  %v397_v5 = vunpack.c.h.bf16 %v87_v51 }
  0xbf   :  { %v227_v9 = vsel %vm223_vm11, %v194_v4, -inf  ;;  %328 = vmatmul.f32.vlgmr.msra.gmra.mxu2 %v540_v7  ;;  %v393_v7 = vld [vmem:[#allocation2 + $0x18] sm:$0xff] }
  0xc0   :  { %v542_v12 = vpop.eup %541  ;;  %v269_v13 = vmul.f32 1.442695, %v227_v9  ;;  %543 = vpow2.f32 %v306_v8  ;;  %v181_v15 = vpop.f32.mrf.mxu3  ;;  %v400_v8 = vsub.f32 %v392_v63, %v396_v57  ;;  %v402_v9 = vand.u32 2147483647, %v398_v58 }
  0xc1   :  { %291 = vmatmul.f32.vlgmr.msra.gmra.mxu1 %v542_v12  ;;  %v192_v20 = vmul.f32 0.0078125, %v181_v15  ;;  %v233_v23 = vmul.f32 0.390625, %v181_v15 }
  0xc2   :  { %545 = vpow2.f32 %v269_v13  ;;  %v404_v19 = vand.u32 2147483647, %v400_v8 }
  0xc3   :  { %547 = vpow2.f32 %v308_v18  ;;  %v196_v25 = vsub.f32 0.0, %v192_v20  ;;  %v266_v27 = vsel %vm262_vm0, %v233_v23, -inf  ;;  %v401_v18 = vsub.f32 %v393_v7, %v397_v5 }
  0xc4   :  { %549 = vpow2.f32 %v271_v21  ;;  %v310_v14 = vmul.f32 1.442695, %v266_v27  ;;  %v406_v20 = vmul.f32 %v402_v9, %v402_v9  ;;  %v407_v21 = vmul.f32 %v403_v10, %v403_v10 }
  0xc5   :  { %v229_v28 = vsel %vm225_vm1, %v196_v25, -inf }
  0xc6   :  { %v544_v24 = vpop.eup %543  ;;  %v273_v31 = vmul.f32 1.442695, %v229_v28  ;;  %551 = vpow2.f32 %v310_v14  ;;  %v405_v28 = vand.u32 2147483647, %v401_v18  ;;  %v410_v14 = vmul.f32 %v406_v20, %v402_v9 }
  0xc7   :  { %331 = vmatmul.f32.gmra.mxu2 %v544_v24 }
  0xc8   :  { %v546_v26 = vpop.eup %545  ;;  %553 = vpow2.f32 %v273_v31 }
  0xc9   :  { %294 = vmatmul.f32.gmra.mxu1 %v546_v26  ;;  %v548_v29 = vpop.eup %547 }
  0xca   :  { %v550_v30 = vpop.eup %549 }
  0xcc   :  { %v552_v32 = vpop.eup %551 }
  0xce   :  { %v554_v33 = vpop.eup %553 }
  0xcf   :  { %334 = vmatmul.f32.gmra.mxu2 %v548_v29  ;;  %v408_v29 = vmul.f32 %v404_v19, %v404_v19 }
  0xd1   :  { %297 = vmatmul.f32.gmra.mxu1 %v550_v30  ;;  %v411_v30 = vmul.f32 %v407_v21, %v403_v10 }
  0xd7   :  { %337 = vmatmul.f32.gmra.mxu2 %v552_v32 }
  0xd9   :  { %300 = vmatmul.f32.gmra.mxu1 %v554_v33 }
 0x13e   :  { %v292_v34 = vpop.f32.mrf.mxu1 }
 0x13f   :  { %v341_v42 = vadd.f32 1.0, %v292_v34 }
 0x142   :  { %v329_v35 = vpop.f32.mrf.mxu2 }
 0x143   :  { %v353_v39 = vadd.f32 1.0, %v329_v35 }
 0x146   :  { %v295_v36 = vpop.f32.mrf.mxu1 }
 0x147   :  { %v342_v41 = vadd.f32 1.0, %v295_v36 }
 0x14a   :  { %v332_v37 = vpop.f32.mrf.mxu2 }
 0x14b   :  { %v354_v38 = vadd.f32 1.0, %v332_v37 }
 0x14d   :  { %555 = vlog2.f32 %v354_v38  ;;  %v409_v38 = vmul.f32 %v405_v28, %v405_v28 }
 0x14e   :  { %v298_v40 = vpop.f32.mrf.mxu1  ;;  %557 = vlog2.f32 %v353_v39  ;;  %v412_v39 = vmul.f32 %v408_v29, %v404_v19 }
 0x14f   :  { %v343_v45 = vadd.f32 1.0, %v298_v40  ;;  %559 = vlog2.f32 %v342_v41  ;;  %v414_v40 = vadd.f32 %v411_v30, %v410_v14 }
 0x151   :  { %v415_v44 = vadd.f32 %v414_v40, %v412_v39 }
 0x152   :  { %v335_v43 = vpop.f32.mrf.mxu2 }
 0x153   :  { %v355_v46 = vadd.f32 1.0, %v335_v43  ;;  %v556_v47 = vpop.eup %555  ;;  %v413_v43 = vmul.f32 %v409_v38, %v405_v28 }
 0x154   :  { %v558_v54 = vpop.eup %557  ;;  %v360_v55 = vmul.f32 0.6931472, %v556_v47 }
 0x155   :  { %561 = vlog2.f32 %v355_v46  ;;  %v560_v60 = vpop.eup %559  ;;  %v358_v61 = vmul.f32 0.6931472, %v558_v54 }
 0x156   :  { %563 = vlog2.f32 %v341_v42  ;;  %v301_v50 = vpop.f32.mrf.mxu1  ;;  %v366_v3 = vmul.f32 0.02, %v360_v55  ;;  %v348_v12 = vmul.f32 0.6931472, %v560_v60 }
 0x157   :  { %565 = vlog2.f32 %v343_v45  ;;  %v344_v56 = vadd.f32 1.0, %v301_v50  ;;  %v365_v11 = vmul.f32 0.02, %v358_v61  ;;  %v416_v45 = vadd.f32 %v415_v44, %v413_v43 }
 0x158   :  { %v370_v16 = vadd.f32 %v366_v3, %v348_v12 }
 0x159   :  { %567 = vlog2.f32 %v344_v56 }
 0x15a   :  { %v338_v62 = vpop.f32.mrf.mxu2  ;;  %v375_v27 = vsel %vm373_vm2, %v370_v16, 0.0 }
 0x15b   :  { %v562_v0 = vpop.eup %561  ;;  %v356_v1 = vadd.f32 1.0, %v338_v62 }
 0x15c   :  { %v564_v2 = vpop.eup %563  ;;  %v362_v4 = vmul.f32 0.6931472, %v562_v0 }
 0x15d   :  { %v566_v6 = vpop.eup %565  ;;  %569 = vlog2.f32 %v356_v1  ;;  %v346_v15 = vmul.f32 0.6931472, %v564_v2 }
 0x15e   :  { %v367_v13 = vmul.f32 0.02, %v362_v4  ;;  %v350_v17 = vmul.f32 0.6931472, %v566_v6 }
 0x15f   :  { %v568_v22 = vpop.eup %567  ;;  %v369_v23 = vadd.f32 %v365_v11, %v346_v15 }
 0x160   :  { %v371_v24 = vadd.f32 %v367_v13, %v350_v17  ;;  %v352_v31 = vmul.f32 0.6931472, %v568_v22 }
 0x161   :  { %v374_v33 = vsel %vm373_vm2, %v369_v23, 0.0 }
 0x162   :  { %v377_v34 = vsel %vm373_vm2, %v371_v24, 0.0  ;;  %v376_v35 = vadd.f32 %v375_v27, %v374_v33 }
 0x163   :  { %v570_v25 = vpop.eup %569 }
 0x164   :  { %v364_v26 = vmul.f32 0.6931472, %v570_v25  ;;  %v378_v37 = vadd.f32 %v377_v34, %v376_v35 }
 0x166   :  { %v368_v32 = vmul.f32 0.02, %v364_v26 }
 0x168   :  { %v372_v36 = vadd.f32 %v368_v32, %v352_v31 }
 0x16a   :  { %v379_v41 = vsel %vm373_vm2, %v372_v36, 0.0 }
 0x16b   :  { %v380_v42 = vadd.f32 %v379_v41, %v378_v37 }
 0x16d   :  { %381 = vadd.xlane.f32.xlu0 %v380_v42 }
 0x175   :  { %417 = vadd.xlane.f32.xlu0 %v416_v45 }
 0x1e0   :  { %v382_v46 = vpop.xlane.xlu0 %381 }
 0x1e1   :  { %v383_v47 = vrot.slane %v382_v46, 4 }
 0x1e3   :  { %v384_v48 = vadd.f32 %v383_v47, %v382_v46 }
 0x1e5   :  { %v385_v49 = vrot.slane %v384_v48, 2 }
 0x1e7   :  { %v386_v50 = vadd.f32 %v385_v49, %v384_v48 }
 0x1e8   :  { %v418_v51 = vpop.xlane.xlu0 %417 }
 0x1e9   :  { %v419_v52 = vrot.slane %v418_v51, 4  ;;  %v387_v53 = vrot.slane %v386_v50, 1 }
 0x1eb   :  { %v420_v54 = vadd.f32 %v419_v52, %v418_v51  ;;  %v388_v55 = vadd.f32 %v387_v53, %v386_v50 }
 0x1ed   :  { %v421_v56 = vrot.slane %v420_v54, 2  ;;  %523 = vpush %v388_v55 }
 0x1ef   :  { %v422_v57 = vadd.f32 %v421_v56, %v420_v54 }
 0x1f1   :  { %v423_v58 = vrot.slane %v422_v57, 1 }
 0x1f3   :  { %v424_v59 = vadd.f32 %v423_v58, %v422_v57 }
 0x1f5   :  { %525 = vpush %v424_v59 }
 0x21e   :  { %s524_s18 = spop %523 }
 0x21f   :  { %v426_v60 = vstv %s524_s18 }
 0x220   :  { %427 = vst [vmem:[#allocation10] sm:$0xff] %v426_v60 }
 0x221   :  { %440 = dma.vmem_to_hbm [thread:$0]  %s436_s3, 128, %s438_s17, [#allocation4]  }
 0x226   :  { %s526_s24 = spop %525 }
 0x227   :  { %v428_v61 = vstv %s526_s24 }
 0x228   :  { %429 = vst [vmem:[#allocation11] sm:$0xff] %v428_v61 }
 0x229   :  { %451 = dma.vmem_to_hbm [thread:$0]  %s447_s20, 128, %s449_s23, [#allocation12]  }
 0x22a   :  { %721 = dma.done.wait [#allocation4], 128  }
 0x22b   :  { %722 = vsyncadd [#allocation4], 4294967168 }
 0x22c   :  { %723 = dma.done.wait [#allocation12], 128  }
 0x22d   :  { %724 = vsyncadd [#allocation12], 4294967168 }
 0x22e   :  { %460 = vsyncpa [#allocation3], 1 }
 0x22f   :  { %461 = vsyncpa [#allocation6], 1 }
 0x230   :  { %462 = vsyncpa [#allocation9], 1 }
 0x231   :  { %463 = vsyncpa [#allocation4], 1 }
 0x232   :  { %464 = vsyncpa [#allocation12], 1 }

</bundles_post_ra>
